<compile_context>
chip_gen: v7x
topology: tpu7x:2x2x1
jax: 0.10.0
libtpu: 0.0.40
codegen_flags: <defaults>
</compile_context>

<pallas_src>
import jax
import jax.numpy as jnp
from jax.experimental import pallas as pl
from jax.experimental.pallas import tpu as pltpu


def flow_resize_label_kernel(latent_ref, cond_ref, onehot_ref,
                             wg_ref, bg_ref, inv_sd_ref, shift_ref,
                             ws_ref, bs_ref, wt_ref, bt_ref,
                             wc_ref, bc_ref, out_ref):
    latent = latent_ref[...]          # (TB, zDim)
    condition = cond_ref[...]         # (TB, yDim)
    onehot = onehot_ref[...]          # (TB, n_seq*n_vol)
    tb = latent.shape[0]

    # --- model_g: ChemVAE-style encoder, 4th return value = embedding ---
    emb = jnp.tanh(
        jnp.dot(onehot, wg_ref[...], preferred_element_type=jnp.float32) + bg_ref[...]
    )                                 # (TB, yDim)

    # --- std_model.standardize_z_torch, folded: (emb - mu)/sd == emb*inv_sd + shift ---
    cond_new = emb * inv_sd_ref[...] + shift_ref[...]

    # --- shared coupling nets s(.), t(.): evaluate for condition AND cond_new
    #     with one matmul each by stacking along the sublane (batch) axis. ---
    stacked = jnp.concatenate([condition, cond_new], axis=0)        # (2*TB, yDim)
    s_both = jnp.dot(stacked, ws_ref[...], preferred_element_type=jnp.float32) + bs_ref[...]
    t_both = jnp.dot(stacked, wt_ref[...], preferred_element_type=jnp.float32) + bt_ref[...]
    s_c, s_cp = s_both[:tb], s_both[tb:]                            # sublane-aligned slices
    t_c, t_cp = t_both[:tb], t_both[tb:]

    # --- model.flow(x, c) forward, then model.flow.reverse(zz, cprime) ---
    zz = latent * jnp.exp(s_c) + t_c
    trans_z = (zz - t_cp) * jnp.exp(-s_cp)                          # (TB, zDim)

    # --- model_class: linear classifier -> logits (lane-dense, padded to 128) ---
    out_ref[...] = (
        jnp.dot(trans_z, wc_ref[...], preferred_element_type=jnp.float32) + bc_ref[...]
    ).astype(out_ref.dtype)


def prepare_params(raw, n_classes):
    """One-time weight prep: fold the standardizer, pad the classifier to 128 lanes."""
    inv_sd = (1.0 / raw["sd"]).astype(jnp.float32)
    shift = (-raw["mu"] * inv_sd).astype(jnp.float32)
    zDim = raw["W_c"].shape[0]
    c_pad = pl.cdiv(n_classes, 128) * 128
    W_c_pad = jnp.zeros((zDim, c_pad), jnp.float32).at[:, :n_classes].set(raw["W_c"])
    b_c_pad = jnp.zeros((1, c_pad), jnp.float32).at[:, :n_classes].set(raw["b_c"])
    return {
        "W_g": raw["W_g"], "b_g": raw["b_g"],
        "inv_sd": inv_sd, "shift": shift,
        "W_s": raw["W_s"], "b_s": raw["b_s"],
        "W_t": raw["W_t"], "b_t": raw["b_t"],
        "W_c": W_c_pad, "b_c": b_c_pad,
    }


def flow_resize_label_forward(input_data, params, *, zDim, yDim, n_classes,
                              block_b=128):
    """Matches FlowResizeLabelClass.forward: packed input_data -> class logits."""
    B, D_total = input_data.shape
    onehot_dim = D_total - zDim - yDim
    c_pad = params["W_c"].shape[1]

    # Split the packed module input OUTSIDE the kernel so every kernel operand
    # is an independently tiled, lane-aligned ref.
    latent = input_data[:, :zDim]
    condition = input_data[:, zDim:zDim + yDim]
    onehot = input_data[:, zDim + yDim:]

    # Batch tile: multiple of 8 sublanes.  For production, size this for the
    # target chip (128-aligned on v5e; ~2-4K rows within v7x's 64 MiB VMEM).
    tb = max(8, ((min(block_b, B) + 7) // 8) * 8)
    B_pad = pl.cdiv(B, tb) * tb
    if B_pad != B:
        pad = ((0, B_pad - B), (0, 0))
        latent = jnp.pad(latent, pad)
        condition = jnp.pad(condition, pad)
        onehot = jnp.pad(onehot, pad)

    grid = (B_pad // tb,)

    flops = int(2 * B_pad * onehot_dim * yDim          # encoder matmul
                + 2 * (2 * B_pad) * yDim * zDim * 2    # stacked s/t matmuls
                + 2 * B_pad * zDim * c_pad             # classifier matmul
                + 12 * B_pad * zDim + 4 * B_pad * yDim)  # elementwise affine work
    transcendentals = int(B_pad * (yDim + 2 * zDim))   # tanh + two exps
    bytes_accessed = int(4 * (B_pad * (zDim + yDim + onehot_dim + c_pad)
                              + onehot_dim * yDim + 2 * yDim * zDim + zDim * c_pad
                              + 3 * yDim + 2 * zDim + c_pad))

    out_padded = pl.pallas_call(
        flow_resize_label_kernel,
        out_shape=jax.ShapeDtypeStruct((B_pad, c_pad), jnp.float32),
        grid_spec=pltpu.PrefetchScalarGridSpec(
            num_scalar_prefetch=0,
            grid=grid,
            in_specs=[
                # batch-tiled activations
                pl.BlockSpec((tb, zDim), lambda i: (i, 0)),
                pl.BlockSpec((tb, yDim), lambda i: (i, 0)),
                pl.BlockSpec((tb, onehot_dim), lambda i: (i, 0)),
                # VMEM-resident weights (same block for every grid step)
                pl.BlockSpec((onehot_dim, yDim), lambda i: (0, 0)),
                pl.BlockSpec((1, yDim), lambda i: (0, 0)),
                pl.BlockSpec((1, yDim), lambda i: (0, 0)),
                pl.BlockSpec((1, yDim), lambda i: (0, 0)),
                pl.BlockSpec((yDim, zDim), lambda i: (0, 0)),
                pl.BlockSpec((1, zDim), lambda i: (0, 0)),
                pl.BlockSpec((yDim, zDim), lambda i: (0, 0)),
                pl.BlockSpec((1, zDim), lambda i: (0, 0)),
                pl.BlockSpec((zDim, c_pad), lambda i: (0, 0)),
                pl.BlockSpec((1, c_pad), lambda i: (0, 0)),
            ],
            out_specs=pl.BlockSpec((tb, c_pad), lambda i: (i, 0)),
        ),
        compiler_params=pltpu.CompilerParams(
            dimension_semantics=("parallel",)),
        cost_estimate=pl.CostEstimate(
            flops=flops,
            transcendentals=transcendentals,
            bytes_accessed=bytes_accessed),
    )(latent, condition, onehot,
      params["W_g"], params["b_g"], params["inv_sd"], params["shift"],
      params["W_s"], params["b_s"], params["W_t"], params["b_t"],
      params["W_c"], params["b_c"])

    return out_padded[:B, :n_classes]


def flow_resize_label_reference(x, p, *, zDim, yDim):
    """Pure-JAX reference in the original (unfolded) module form."""
    latent = x[:, :zDim]
    condition = x[:, zDim:zDim + yDim]
    onehot = x[:, zDim + yDim:]
    emb = jnp.tanh(onehot @ p["W_g"] + p["b_g"])
    cond_new = (emb - p["mu"]) / p["sd"]
    s_c = condition @ p["W_s"] + p["b_s"]
    t_c = condition @ p["W_t"] + p["b_t"]
    zz = latent * jnp.exp(s_c) + t_c
    s_cp = cond_new @ p["W_s"] + p["b_s"]
    t_cp = cond_new @ p["W_t"] + p["b_t"]
    trans_z = (zz - t_cp) * jnp.exp(-s_cp)
    return trans_z @ p["W_c"] + p["b_c"]


if __name__ == "__main__":
    # Small shapes consistent with the module's forward.
    B, zDim, yDim, n_seq, n_vol, n_classes = 64, 32, 16, 8, 16, 10
    onehot_dim = n_seq * n_vol                     # 128: lane-aligned

    key = jax.random.PRNGKey(0)
    ks = jax.random.split(key, 12)

    # Deterministic synthetic parameters (shapes follow the sub-model roles).
    raw_params = {
        "W_g": 0.05 * jax.random.normal(ks[0], (onehot_dim, yDim), jnp.float32),
        "b_g": 0.01 * jax.random.normal(ks[1], (1, yDim), jnp.float32),
        "mu": 0.1 * jax.random.normal(ks[2], (1, yDim), jnp.float32),
        "sd": 1.0 + 0.1 * jax.random.uniform(ks[3], (1, yDim), jnp.float32),
        "W_s": 0.05 * jax.random.normal(ks[4], (yDim, zDim), jnp.float32),
        "b_s": 0.01 * jax.random.normal(ks[5], (1, zDim), jnp.float32),
        "W_t": 0.05 * jax.random.normal(ks[6], (yDim, zDim), jnp.float32),
        "b_t": 0.01 * jax.random.normal(ks[7], (1, zDim), jnp.float32),
        "W_c": 0.05 * jax.random.normal(ks[8], (zDim, n_classes), jnp.float32),
        "b_c": 0.01 * jax.random.normal(ks[9], (1, n_classes), jnp.float32),
    }
    params = prepare_params(raw_params, n_classes)

    # Build input_data = [latent | condition | flattened one-hot perturbation],
    # matching the module's packed input signature.
    latent = jax.random.normal(ks[10], (B, zDim), jnp.float32)
    condition = jax.random.normal(ks[11], (B, yDim), jnp.float32)
    idx = jax.random.randint(jax.random.fold_in(key, 99), (B, n_seq), 0, n_vol)
    trt_onehot = jax.nn.one_hot(idx, n_vol, dtype=jnp.float32)     # (B, n_seq, n_vol)
    input_data = jnp.concatenate(
        [latent, condition, trt_onehot.reshape(B, onehot_dim)], axis=1
    )

    out = flow_resize_label_forward(
        input_data, params, zDim=zDim, yDim=yDim, n_classes=n_classes, block_b=32
    )
    out = jax.block_until_ready(out)

    ref = flow_resize_label_reference(input_data, raw_params, zDim=zDim, yDim=yDim)
    assert out.shape == (B, n_classes)
    assert jnp.allclose(out, ref, atol=1e-4, rtol=1e-4), "mismatch vs reference"
    print("KERNEL_OK")
</pallas_src>

<mosaic_0001>
module attributes {stable_mosaic.version = 11 : i64} {
  func.func @flow_resize_label_kernel(%arg0: i32, %arg1: memref<32x32xf32, #tpu.memory_space<vmem>>, %arg2: memref<32x16xf32, #tpu.memory_space<vmem>>, %arg3: memref<32x128xf32, #tpu.memory_space<vmem>>, %arg4: memref<128x16xf32, #tpu.memory_space<vmem>>, %arg5: memref<1x16xf32, #tpu.memory_space<vmem>>, %arg6: memref<1x16xf32, #tpu.memory_space<vmem>>, %arg7: memref<1x16xf32, #tpu.memory_space<vmem>>, %arg8: memref<16x32xf32, #tpu.memory_space<vmem>>, %arg9: memref<1x32xf32, #tpu.memory_space<vmem>>, %arg10: memref<16x32xf32, #tpu.memory_space<vmem>>, %arg11: memref<1x32xf32, #tpu.memory_space<vmem>>, %arg12: memref<32x128xf32, #tpu.memory_space<vmem>>, %arg13: memref<1x128xf32, #tpu.memory_space<vmem>>, %arg14: memref<32x128xf32, #tpu.memory_space<vmem>>) attributes {dimension_semantics = [#tpu.dimension_semantics<parallel>], iteration_bounds = array<i64: 2>, scalar_prefetch = 0 : i64, scratch_operands = 0 : i64, tpu.core_type = #tpu.core_type<tc>, window_params = [{transform_indices = @transform_0, window_bounds = array<i64: 32, 32>}, {transform_indices = @transform_1, window_bounds = array<i64: 32, 16>}, {transform_indices = @transform_2, window_bounds = array<i64: 32, 128>}, {pipeline_mode = #tpu.pipeline_mode<synchronous>, transform_indices = @transform_3, window_bounds = array<i64: 128, 16>}, {pipeline_mode = #tpu.pipeline_mode<synchronous>, transform_indices = @transform_4, window_bounds = array<i64: 1, 16>}, {pipeline_mode = #tpu.pipeline_mode<synchronous>, transform_indices = @transform_5, window_bounds = array<i64: 1, 16>}, {pipeline_mode = #tpu.pipeline_mode<synchronous>, transform_indices = @transform_6, window_bounds = array<i64: 1, 16>}, {pipeline_mode = #tpu.pipeline_mode<synchronous>, transform_indices = @transform_7, window_bounds = array<i64: 16, 32>}, {pipeline_mode = #tpu.pipeline_mode<synchronous>, transform_indices = @transform_8, window_bounds = array<i64: 1, 32>}, {pipeline_mode = #tpu.pipeline_mode<synchronous>, transform_indices = @transform_9, window_bounds = array<i64: 16, 32>}, {pipeline_mode = #tpu.pipeline_mode<synchronous>, transform_indices = @transform_10, window_bounds = array<i64: 1, 32>}, {pipeline_mode = #tpu.pipeline_mode<synchronous>, transform_indices = @transform_11, window_bounds = array<i64: 32, 128>}, {pipeline_mode = #tpu.pipeline_mode<synchronous>, transform_indices = @transform_12, window_bounds = array<i64: 1, 128>}, {transform_indices = @transform_13, window_bounds = array<i64: 32, 128>}]} {
    %c0 = arith.constant 0 : index
    %c0_0 = arith.constant 0 : index
    %0 = vector.load %arg1[%c0, %c0_0] : memref<32x32xf32, #tpu.memory_space<vmem>>, vector<32x32xf32>
    %c0_1 = arith.constant 0 : index
    %c0_2 = arith.constant 0 : index
    %1 = vector.load %arg2[%c0_1, %c0_2] : memref<32x16xf32, #tpu.memory_space<vmem>>, vector<32x16xf32>
    %c0_3 = arith.constant 0 : index
    %c0_4 = arith.constant 0 : index
    %2 = vector.load %arg3[%c0_3, %c0_4] : memref<32x128xf32, #tpu.memory_space<vmem>>, vector<32x128xf32>
    %c0_5 = arith.constant 0 : index
    %c0_6 = arith.constant 0 : index
    %3 = vector.load %arg4[%c0_5, %c0_6] : memref<128x16xf32, #tpu.memory_space<vmem>>, vector<128x16xf32>
    %cst = arith.constant dense<0.000000e+00> : vector<32x16xf32>
    %4 = tpu.matmul %2, %3, %cst {dimension_numbers = #tpu.dot_dimension_numbers<[1], [0], [0], [1], [0, 0, 1, 1], [], []>} : vector<32x128xf32>, vector<128x16xf32>, vector<32x16xf32> -> vector<32x16xf32>
    %c0_7 = arith.constant 0 : index
    %c0_8 = arith.constant 0 : index
    %5 = vector.load %arg5[%c0_7, %c0_8] : memref<1x16xf32, #tpu.memory_space<vmem>>, vector<1x16xf32>
    %6 = vector.broadcast %5 : vector<1x16xf32> to vector<32x16xf32>
    %7 = arith.addf %4, %6 : vector<32x16xf32>
    %8 = math.tanh %7 : vector<32x16xf32>
    %c0_9 = arith.constant 0 : index
    %c0_10 = arith.constant 0 : index
    %9 = vector.load %arg6[%c0_9, %c0_10] : memref<1x16xf32, #tpu.memory_space<vmem>>, vector<1x16xf32>
    %10 = vector.broadcast %9 : vector<1x16xf32> to vector<32x16xf32>
    %11 = arith.mulf %8, %10 : vector<32x16xf32>
    %c0_11 = arith.constant 0 : index
    %c0_12 = arith.constant 0 : index
    %12 = vector.load %arg7[%c0_11, %c0_12] : memref<1x16xf32, #tpu.memory_space<vmem>>, vector<1x16xf32>
    %13 = vector.broadcast %12 : vector<1x16xf32> to vector<32x16xf32>
    %14 = arith.addf %11, %13 : vector<32x16xf32>
    %15 = tpu.concatenate %1, %14 in 0 : vector<32x16xf32>, vector<32x16xf32> -> vector<64x16xf32>
    %c0_13 = arith.constant 0 : index
    %c0_14 = arith.constant 0 : index
    %16 = vector.load %arg8[%c0_13, %c0_14] : memref<16x32xf32, #tpu.memory_space<vmem>>, vector<16x32xf32>
    %cst_15 = arith.constant dense<0.000000e+00> : vector<64x32xf32>
    %17 = tpu.matmul %15, %16, %cst_15 {dimension_numbers = #tpu.dot_dimension_numbers<[1], [0], [0], [1], [0, 0, 1, 1], [], []>} : vector<64x16xf32>, vector<16x32xf32>, vector<64x32xf32> -> vector<64x32xf32>
    %c0_16 = arith.constant 0 : index
    %c0_17 = arith.constant 0 : index
    %18 = vector.load %arg9[%c0_16, %c0_17] : memref<1x32xf32, #tpu.memory_space<vmem>>, vector<1x32xf32>
    %19 = vector.broadcast %18 : vector<1x32xf32> to vector<64x32xf32>
    %20 = arith.addf %17, %19 : vector<64x32xf32>
    %c0_18 = arith.constant 0 : index
    %c0_19 = arith.constant 0 : index
    %21 = vector.load %arg10[%c0_18, %c0_19] : memref<16x32xf32, #tpu.memory_space<vmem>>, vector<16x32xf32>
    %cst_20 = arith.constant dense<0.000000e+00> : vector<64x32xf32>
    %22 = tpu.matmul %15, %21, %cst_20 {dimension_numbers = #tpu.dot_dimension_numbers<[1], [0], [0], [1], [0, 0, 1, 1], [], []>} : vector<64x16xf32>, vector<16x32xf32>, vector<64x32xf32> -> vector<64x32xf32>
    %c0_21 = arith.constant 0 : index
    %c0_22 = arith.constant 0 : index
    %23 = vector.load %arg11[%c0_21, %c0_22] : memref<1x32xf32, #tpu.memory_space<vmem>>, vector<1x32xf32>
    %24 = vector.broadcast %23 : vector<1x32xf32> to vector<64x32xf32>
    %25 = arith.addf %22, %24 : vector<64x32xf32>
    %26 = vector.extract_strided_slice %20 {offsets = [0, 0], sizes = [32, 32], strides = [1, 1]} : vector<64x32xf32> to vector<32x32xf32>
    %27 = vector.extract_strided_slice %20 {offsets = [32, 0], sizes = [32, 32], strides = [1, 1]} : vector<64x32xf32> to vector<32x32xf32>
    %28 = vector.extract_strided_slice %25 {offsets = [0, 0], sizes = [32, 32], strides = [1, 1]} : vector<64x32xf32> to vector<32x32xf32>
    %29 = vector.extract_strided_slice %25 {offsets = [32, 0], sizes = [32, 32], strides = [1, 1]} : vector<64x32xf32> to vector<32x32xf32>
    %30 = math.exp %26 : vector<32x32xf32>
    %31 = arith.mulf %0, %30 : vector<32x32xf32>
    %32 = arith.addf %31, %28 : vector<32x32xf32>
    %33 = arith.subf %32, %29 : vector<32x32xf32>
    %cst_23 = arith.constant 0.000000e+00 : f32
    %34 = vector.broadcast %cst_23 : f32 to vector<32x32xf32>
    %35 = arith.subf %34, %27 : vector<32x32xf32>
    %36 = math.exp %35 : vector<32x32xf32>
    %37 = arith.mulf %33, %36 : vector<32x32xf32>
    %c0_24 = arith.constant 0 : index
    %c0_25 = arith.constant 0 : index
    %38 = vector.load %arg12[%c0_24, %c0_25] : memref<32x128xf32, #tpu.memory_space<vmem>>, vector<32x128xf32>
    %cst_26 = arith.constant dense<0.000000e+00> : vector<32x128xf32>
    %39 = tpu.matmul %37, %38, %cst_26 {dimension_numbers = #tpu.dot_dimension_numbers<[1], [0], [0], [1], [0, 0, 1, 1], [], []>} : vector<32x32xf32>, vector<32x128xf32>, vector<32x128xf32> -> vector<32x128xf32>
    %c0_27 = arith.constant 0 : index
    %c0_28 = arith.constant 0 : index
    %40 = vector.load %arg13[%c0_27, %c0_28] : memref<1x128xf32, #tpu.memory_space<vmem>>, vector<1x128xf32>
    %41 = vector.broadcast %40 : vector<1x128xf32> to vector<32x128xf32>
    %42 = arith.addf %39, %41 : vector<32x128xf32>
    %c0_29 = arith.constant 0 : index
    %c0_30 = arith.constant 0 : index
    %43 = vector.load %arg14[%c0_29, %c0_30] : memref<32x128xf32, #tpu.memory_space<vmem>>, vector<32x128xf32>
    tpu.vector_store %arg14[%c0_29, %c0_30], %42 {strides = array<i32>} : memref<32x128xf32, #tpu.memory_space<vmem>>, vector<32x128xf32>,
    return
  }
  func.func @transform_0(%arg0: i32) -> (i32, i32) {
    %c0_i32 = arith.constant 0 : i32
    %c0_i32_0 = arith.constant 0 : i32
    return %arg0, %c0_i32 : i32, i32
  }
  func.func @transform_1(%arg0: i32) -> (i32, i32) {
    %c0_i32 = arith.constant 0 : i32
    %c0_i32_0 = arith.constant 0 : i32
    return %arg0, %c0_i32 : i32, i32
  }
  func.func @transform_2(%arg0: i32) -> (i32, i32) {
    %c0_i32 = arith.constant 0 : i32
    %c0_i32_0 = arith.constant 0 : i32
    return %arg0, %c0_i32 : i32, i32
  }
  func.func @transform_3(%arg0: i32) -> (i32, i32) {
    %c0_i32 = arith.constant 0 : i32
    %c0_i32_0 = arith.constant 0 : i32
    %c0_i32_1 = arith.constant 0 : i32
    return %c0_i32, %c0_i32_0 : i32, i32
  }
  func.func @transform_4(%arg0: i32) -> (i32, i32) {
    %c0_i32 = arith.constant 0 : i32
    %c0_i32_0 = arith.constant 0 : i32
    %c0_i32_1 = arith.constant 0 : i32
    return %c0_i32, %c0_i32_0 : i32, i32
  }
  func.func @transform_5(%arg0: i32) -> (i32, i32) {
    %c0_i32 = arith.constant 0 : i32
    %c0_i32_0 = arith.constant 0 : i32
    %c0_i32_1 = arith.constant 0 : i32
    return %c0_i32, %c0_i32_0 : i32, i32
  }
  func.func @transform_6(%arg0: i32) -> (i32, i32) {
    %c0_i32 = arith.constant 0 : i32
    %c0_i32_0 = arith.constant 0 : i32
    %c0_i32_1 = arith.constant 0 : i32
    return %c0_i32, %c0_i32_0 : i32, i32
  }
  func.func @transform_7(%arg0: i32) -> (i32, i32) {
    %c0_i32 = arith.constant 0 : i32
    %c0_i32_0 = arith.constant 0 : i32
    %c0_i32_1 = arith.constant 0 : i32
    return %c0_i32, %c0_i32_0 : i32, i32
  }
  func.func @transform_8(%arg0: i32) -> (i32, i32) {
    %c0_i32 = arith.constant 0 : i32
    %c0_i32_0 = arith.constant 0 : i32
    %c0_i32_1 = arith.constant 0 : i32
    return %c0_i32, %c0_i32_0 : i32, i32
  }
  func.func @transform_9(%arg0: i32) -> (i32, i32) {
    %c0_i32 = arith.constant 0 : i32
    %c0_i32_0 = arith.constant 0 : i32
    %c0_i32_1 = arith.constant 0 : i32
    return %c0_i32, %c0_i32_0 : i32, i32
  }
  func.func @transform_10(%arg0: i32) -> (i32, i32) {
    %c0_i32 = arith.constant 0 : i32
    %c0_i32_0 = arith.constant 0 : i32
    %c0_i32_1 = arith.constant 0 : i32
    return %c0_i32, %c0_i32_0 : i32, i32
  }
  func.func @transform_11(%arg0: i32) -> (i32, i32) {
    %c0_i32 = arith.constant 0 : i32
    %c0_i32_0 = arith.constant 0 : i32
    %c0_i32_1 = arith.constant 0 : i32
    return %c0_i32, %c0_i32_0 : i32, i32
  }
  func.func @transform_12(%arg0: i32) -> (i32, i32) {
    %c0_i32 = arith.constant 0 : i32
    %c0_i32_0 = arith.constant 0 : i32
    %c0_i32_1 = arith.constant 0 : i32
    return %c0_i32, %c0_i32_0 : i32, i32
  }
  func.func @transform_13(%arg0: i32) -> (i32, i32) {
    %c0_i32 = arith.constant 0 : i32
    %c0_i32_0 = arith.constant 0 : i32
    return %arg0, %c0_i32 : i32, i32
  }
}

</mosaic_0001>

<bundles_post_ra>
// kernel: tpu_custom_call.1
= control target key start
LH: loop header
LB: loop body
LE: loop exit
PB: predicated region body
PF: predicated region fallthrough
CT: control target
= control target key end

     0   :  { %s1790_s0 = inlined_call_operand.vmem [shape: f32[64,32], index: 0, kind: input, shape index: {}]   ;;  %s1791_s1 = inlined_call_operand.vmem [shape: f32[64,16], index: 1, kind: input, shape index: {}]   ;;  %s1792_s2 = inlined_call_operand.vmem [shape: f32[64,128], index: 2, kind: input, shape index: {}]   ;;  %s1793_s3 = inlined_call_operand.vmem [shape: f32[128,16], index: 3, kind: input, shape index: {}]   ;;  %s1794_s4 = inlined_call_operand.vmem [shape: f32[1,16], index: 4, kind: input, shape index: {}]   ;;  %s1795_s5 = inlined_call_operand.vmem [shape: f32[1,16], index: 5, kind: input, shape index: {}]   ;;  %s1796_s6 = inlined_call_operand.vmem [shape: f32[1,16], index: 6, kind: input, shape index: {}]   ;;  %s1797_s7 = inlined_call_operand.vmem [shape: f32[16,32], index: 7, kind: input, shape index: {}]   ;;  %s1798_s8 = inlined_call_operand.vmem [shape: f32[1,32], index: 8, kind: input, shape index: {}]   ;;  %s1799_s9 = inlined_call_operand.vmem [shape: f32[16,32], index: 9, kind: input, shape index: {}]   ;;  %s1800_s10 = inlined_call_operand.vmem [shape: f32[1,32], index: 10, kind: input, shape index: {}]   ;;  %s1801_s11 = inlined_call_operand.vmem [shape: f32[32,128], index: 11, kind: input, shape index: {}]   ;;  %s1802_s12 = inlined_call_operand.vmem [shape: f32[1,128], index: 12, kind: input, shape index: {}]   ;;  %s1803_s13 = inlined_call_operand.hbm [shape: f32[64,128], index: 13, kind: output, shape index: {}]  }
   0x1   :  { %1807 = sst [smem:[#allocation8_spill]] %s1792_s2 }
   0x2   :  { %18 = vsyncpa [#allocation3], 0 }
   0x3   :  { %20 = vsyncpa [#allocation3 + $0x1], 0  ;;  %s1559_s25 = smov 0   ;;  %s1561_s26 = smov 0  }
   0x4   :  { %s1563_s27 = smov 0   ;;  %s1565_s28 = smov 0  }
   0x5 LB: > { %1808 = sst [smem:[#allocation5_spill]] %s1480_s27  ;;  %s1580_s29 = sadd.s32 4294967295, %s1484_s28   ;;  %s1484_s28 = sphi %s1565_s28, %s1814_s28   ;;  %s1480_s27 = sphi %s1563_s27, %s1816_s27   ;;  %s1476_s26 = sphi %s1561_s26, %s1818_s26   ;;  %s1472_s25 = sphi %s1559_s25, %s1817_s25  }
   0x6   : > { %s1134_s30 = sadd.s32 4294967294, %s1484_s28   ;;  %s1584_s14 = sadd.s32 1, %s1484_s28  }
   0x7   : > { %1809 = sst [smem:[#allocation6_spill]] %s1584_s14  ;;  %s321_s15 = sadd.s32 1, %s1480_s27 }
   0x8   : > { %s318_s16 = ssub.s32 %s1484_s28, %s1584_s14  ;;  %p331_p0 = scmp.ne.s32.totalorder %s1480_s27, %s1476_s26 }
   0x9   : > { %p319_p1 = scmp.eq.s32.totalorder %s318_s16, 0  ;;  %p332_p2 = scmp.eq.s32.totalorder %s1580_s29, 1 }
   0xa   : > { %p337_p3 = scmp.ne.s32.totalorder %s1476_s26, %s1472_s25  ;;  %p338_p4 = scmp.eq.s32.totalorder %s1134_s30, 1 }
   0xb   : > { %s1595_s17 = scalar_select %p319_p1, %s1480_s27, %s321_s15  }
   0xc   : > { %p1597_p5 = por %p332_p2, %p331_p0  ;;  %p1601_p6 = por %p338_p4, %p337_p3 }
   0xd   : > { %1810 = sst [smem:[#allocation7_spill]] %s1595_s17  ;;  %p1137_p7 = scmp.ge.s32.totalorder %s1484_s28, 1 }
   0xe   : > { %p413_p8 = scmp.lt.s32.totalorder %s1484_s28, 3 }
  0x10   : > { %p414_p9 = pnand %p1137_p7, %p413_p8 }
  0x11   : > { %v498_v0 = vld [vmem:[%s1793_s3] sm:$0xff] (!%p414_p9)  ;;  %v499_v1 = vld [vmem:[%s1793_s3 + $0x8] sm:$0xff] (!%p414_p9)  ;;  %v500_v2 = vld [vmem:[%s1793_s3 + $0x10] sm:$0xff] (!%p414_p9)  ;;  %s1139_s15 = sshll.u32 (!%p414_p9), %s1580_s29, 2  ;;  %s1813_s2 = sld [smem:[#allocation8_spill]] (!%p414_p9)  ;;  %vm641_vm0 = vcmask (!%p414_p9), 130048  }
  0x12   : > { %417 = sbr.rel (%p414_p9) target bundleno = 753 (0x2f1), region = 72  ;;  %v1309_v3 = vpack.c.bf16 (!%p414_p9), %v499_v1, %v498_v0  ;;  %v501_v4 = vld [vmem:[%s1793_s3 + $0x18] sm:$0xff] (!%p414_p9)  ;;  %p468_p10 = scmp.lt.s32.totalorder (!%p414_p9), %s1139_s15, 7  ;;  %v502_v6 = vld [vmem:[%s1793_s3 + $0x20] sm:$0xff] (!%p414_p9)  ;;  %v503_v7 = vld [vmem:[%s1793_s3 + $0x28] sm:$0xff] (!%p414_p9)  ;;  %vm932_vm1 = vcmask (!%p414_p9), 261120  }
  0x13   : > { %v1313_v5 = vpack.c.bf16 (!%p414_p9), %v501_v4, %v500_v2  ;;  %v1317_v8 = vpack.c.bf16 (!%p414_p9), %v503_v7, %v502_v6  ;;  %v504_v9 = vld [vmem:[%s1793_s3 + $0x30] sm:$0xff] (!%p414_p9)  ;;  %v505_v10 = vld [vmem:[%s1793_s3 + $0x38] sm:$0xff] (!%p414_p9)  ;;  %v506_v13 = vld [vmem:[%s1793_s3 + $0x40] sm:$0xff] (!%p414_p9)  ;;  %s1176_s20 = sshll.u32 (!%p414_p9), %s1580_s29, 9  ;;  %s1486_s30 = smov (!%p414_p9), [#allocation2]  }
  0x14   : > { %1310 = vmatprep.subr.bf16.mxu0 (!%p414_p9), %v1309_v3  ;;  %v1321_v12 = vpack.c.bf16 (!%p414_p9), %v505_v10, %v504_v9  ;;  %v507_v14 = vld [vmem:[%s1793_s3 + $0x48] sm:$0xff] (!%p414_p9)  ;;  %v508_v16 = vld [vmem:[%s1793_s3 + $0x50] sm:$0xff] (!%p414_p9)  ;;  %v509_v17 = vld [vmem:[%s1793_s3 + $0x58] sm:$0xff] (!%p414_p9) }
  0x15   : > { %1312 = vmatpush3.bf16.msra.mxu0 (!%p414_p9), %v1309_v3  ;;  %v1325_v15 = vpack.c.bf16 (!%p414_p9), %v507_v14, %v506_v13  ;;  %v1329_v18 = vpack.c.bf16 (!%p414_p9), %v509_v17, %v508_v16  ;;  %v510_v19 = vld [vmem:[%s1793_s3 + $0x60] sm:$0xff] (!%p414_p9)  ;;  %v511_v20 = vld [vmem:[%s1793_s3 + $0x68] sm:$0xff] (!%p414_p9)  ;;  %v512_v22 = vld [vmem:[%s1793_s3 + $0x70] sm:$0xff] (!%p414_p9) }
  0x16   : > { %1314 = vmatprep.subr.bf16.mxu0 (!%p414_p9), %v1313_v5  ;;  %v1333_v21 = vpack.c.bf16 (!%p414_p9), %v511_v20, %v510_v19  ;;  %v513_v23 = vld [vmem:[%s1793_s3 + $0x78] sm:$0xff] (!%p414_p9)  ;;  %v632_v28 = vld [vmem:[%s1797_s7] sm:$0xff] (!%p414_p9)  ;;  %v633_v29 = vld [vmem:[%s1797_s7 + $0x8] sm:$0xff] (!%p414_p9) }
  0x17   : > { %v1337_v24 = vpack.c.bf16 (!%p414_p9), %v513_v23, %v512_v22  ;;  %v1341_v30 = vpack.c.bf16 (!%p414_p9), %v633_v29, %v632_v28  ;;  %v771_v31 = vld [vmem:[%s1799_s9] sm:$0xff] (!%p414_p9)  ;;  %v772_v32 = vld [vmem:[%s1799_s9 + $0x8] sm:$0xff] (!%p414_p9)  ;;  %v923_v4 = vld [vmem:[%s1801_s11 + $0x10] sm:$0xff] (!%p414_p9) }
  0x18   : > { %v1345_v35 = vpack.c.bf16 (!%p414_p9), %v772_v32, %v771_v31  ;;  %v1145_v38 = vld [vmem:[%s1794_s4] ss:$0 sm:$0xff] (!%p414_p9)  ;;  %v922_v2 = vld [vmem:[%s1801_s11 + $0x8] sm:$0xff] (!%p414_p9) }
  0x19   : > { %s1820_s15 = smov (!%p468_p10, %s1139_s15), 7  ;;  %1316 = vmatpush3.bf16.msra.mxu0 %v1313_v5  ;;  %1342 = vmatprep.subr.bf16.mxu1 %v1341_v30  ;;  %v1146_v47 = vld [vmem:[%s1795_s5] ss:$0 sm:$0xff]  ;;  %v924_v5 = vld [vmem:[%s1801_s11 + $0x18] sm:$0xff] }
  0x1a   : > { %s1626_s22 = sshll.u32 %s1820_s15, 3  ;;  %1318 = vmatprep.subr.bf16.mxu0 %v1317_v8  ;;  %1344 = vmatpush3.bf16.msra.mxu1 %v1341_v30  ;;  %v1147_v50 = vld [vmem:[%s1796_s6] ss:$0 sm:$0xff]  ;;  %v1353_v6 = vpack.c.bf16 %v924_v5, %v923_v4 }
  0x1b   : > { %s1638_s14 = scalar_lea.vmem %s1813_s2, %s1626_s22  ;;  %s477_s17 = scalar_lea.vmem %s1791_s1, %s1626_s22  ;;  %1346 = vmatprep.subr.bf16.mxu1 %v1345_v35  ;;  %v921_v1 = vld [vmem:[%s1801_s11] sm:$0xff] }
  0x1c   : > { %v494_v11 = vld [vmem:[%s1638_s14] sm:$0xff]  ;;  %v495_v25 = vld [vmem:[%s1638_s14 + $0x8] sm:$0xff]  ;;  %v496_v26 = vld [vmem:[%s1638_s14 + $0x10] sm:$0xff]  ;;  %v1349_v3 = vpack.c.bf16 %v922_v2, %v921_v1 }
  0x1d   : > { %1257 = vmatprep.mubr.f32.mxu0 %v494_v11  ;;  %1320 = vmatpush3.bf16.msra.mxu0 %v1317_v8  ;;  %v497_v27 = vld [vmem:[%s1638_s14 + $0x18] sm:$0xff]  ;;  %v490_v33 = vld [vmem:[%s477_s17] sm:$0xff]  ;;  %v491_v34 = vld [vmem:[%s477_s17 + $0x8] sm:$0xff] }
  0x1e   : > { %1322 = vmatprep.subr.bf16.mxu0 %v1321_v12  ;;  %v492_v36 = vld [vmem:[%s477_s17 + $0x10] sm:$0xff]  ;;  %1267 = vmatprep.mubr.msk.f32.mxu1 %vm641_vm0, %v490_v33  ;;  %v493_v37 = vld [vmem:[%s477_s17 + $0x18] sm:$0xff]  ;;  %v1148_v7 = vld [vmem:[%s1798_s8] ss:$0 sm:$0xff]  ;;  %s1728_s17 = scalar_lea.vmem %s1790_s0, %s1626_s22  ;;  %s464_s22 = sand.u32 1, %s1476_s26  }
  0x1f   : > { %1268 = vmatmul.mubr.msk.f32.vlgmr.msra.gmra.mrb[0].mxu1 %vm641_vm0, %v491_v34  ;;  %v1157_v29 = vld [vmem:[%s1800_s10] ss:$0 sm:$0xff]  ;;  %s1138_s14 = sshll.u32 %s464_s22, 5  ;;  %s1749_s24 = scalar_lea.sflag [#allocation3], %s464_s22 }
  0x20   : > { %1348 = vmatpush3.bf16.msra.mxu1 %v1345_v35  ;;  %1270 = vmatprep.mubr.msk.f32.mxu1 %vm641_vm0, %v492_v36  ;;  %s466_s2 = scalar_lea.vmem [#allocation2], %s1138_s14  ;;  %s1426_s14 = sshll.u32 %s1486_s30, 4  ;;  %s1427_s14 = int_to_ptr.vmem [resolvable:$false] %s1426_s14 }
  0x21   : > { %1324 = vmatpush3.bf16.msra.mxu0 %v1321_v12  ;;  %1350 = vmatprep.subr.bf16.mxu1 %v1349_v3  ;;  %s1048_s15 = sshll.u32 %s466_s2, 4  ;;  %s1428_s27 = scalar_lea.vmem %s1427_s14, 1024  ;;  %s1742_s15 = int_to_ptr.vmem [resolvable:$true] %s1048_s15 }
  0x22   : > { %1326 = vmatprep.subr.bf16.mxu0 %v1325_v15  ;;  %s1422_s29 = scalar_lea.vmem %s1742_s15, 512  ;;  %p1429_p0 = scmp.lt.s32.totalorder %s1742_s15, %s1427_s14 }
  0x23   : > { %1271 = vmatmul.mubr.msk.f32.gmra.mrb[2].mxu1 %vm641_vm0, %v493_v37  ;;  %p1423_p11 = scmp.ne.s32.totalorder %s1742_s15, %s1422_s29  ;;  %p1430_p1 = scmp.lt.s32.totalorder %s1428_s27, %s1422_s29 }
  0x25   : > { %1328 = vmatpush3.bf16.msra.mxu0 %v1325_v15  ;;  %p1424_p12 = pnand %p1423_p11, %p1597_p5  ;;  %p1431_p2 = por %p1430_p1, %p1429_p0 }
  0x26   : > { %1330 = vmatprep.subr.bf16.mxu0 %v1329_v18 }
  0x27   : > { %p1425_p13 = pneg %p1424_p12 }
  0x29   : > { %1332 = vmatpush3.bf16.msra.mxu0 %v1329_v18  ;;  %p1432_p3 = pnand %p1431_p2, %p1425_p13 }
  0x2a   : > { %1334 = vmatprep.subr.bf16.mxu0 %v1333_v21 }
  0x2d   : > { %1336 = vmatpush3.bf16.msra.mxu0 %v1333_v21 }
  0x2e   : > { %1338 = vmatprep.subr.bf16.mxu0 %v1337_v24 }
  0x31   : > { %1340 = vmatpush3.bf16.msra.mxu0 %v1337_v24  ;;  %v487_v24 = vld [vmem:[%s1728_s17 + $0x8] sm:$0xff] }
  0x34   : > { %1258 = vmatmul.mubr.f32.vlgmr.msra.gmra.mrb[0].mxu0 %v495_v25 }
  0x35   : > { %1260 = vmatprep.mubr.f32.mxu0 %v496_v26 }
  0x38   : > { %1261 = vmatmul.mubr.f32.gmra.mrb[2].mxu0 %v497_v27 }
  0xf2   : > { %v1269_v61 = vpop.f32.mrb[0].mxu1 }
  0xf3   : > { %v732_v62 = vpop.f32.mrb[1].mxu1  ;;  %v738_v8 = vadd.f32 %v1269_v61, %v1148_v7 }
  0xf4   : > { %v733_v9 = vadd.f32 %v1148_v7, %v732_v62 }
  0xf5   : > { %v887_v10 = vmul.f32 1.442695, %v738_v8 }
  0xf6   : > { %v1272_v63 = vpop.f32.mrb[2].mxu1  ;;  %v885_v12 = vmul.f32 1.442695, %v733_v9 }
  0xf7   : > { %v742_v0 = vpop.f32.mrb[3].mxu1  ;;  %v748_v11 = vadd.f32 %v1272_v63, %v1148_v7 }
  0xf8   : > { %v743_v13 = vadd.f32 %v1148_v7, %v742_v0 }
  0xf9   : > { %v891_v14 = vmul.f32 1.442695, %v748_v11 }
  0xfa   : > { %v889_v15 = vmul.f32 1.442695, %v743_v13  ;;  %v1166_v13 = vld [vmem:[%s1802_s12] ss:$0 sm:$0xff] }
 0x107   : > { %v1259_v39 = vpop.f32.mrb[0].mxu0 }
 0x108   : > { %v593_v40 = vadd.f32 %v1259_v39, %v1145_v38  ;;  %v587_v41 = vpop.f32.mrb[1].mxu0 }
 0x109   : > { %v588_v42 = vadd.f32 %v1145_v38, %v587_v41 }
 0x10a   : > { %1398 = vtanh.f32 %v593_v40 }
 0x10b   : > { %1400 = vtanh.f32 %v588_v42  ;;  %v1262_v43 = vpop.f32.mrb[2].mxu0 }
 0x10c   : > { %v603_v44 = vadd.f32 %v1262_v43, %v1145_v38  ;;  %v597_v45 = vpop.f32.mrb[3].mxu0 }
 0x10d   : > { %v598_v46 = vadd.f32 %v1145_v38, %v597_v45  ;;  %v489_v38 = vld [vmem:[%s1728_s17 + $0x18] sm:$0xff] }
 0x10e   : > { %1402 = vtanh.f32 %v603_v44 }
 0x10f   : > { %1404 = vtanh.f32 %v598_v46 }
 0x110   : > { %1406 = vpow2.f32 %v887_v10 }
 0x111   : > { %1408 = vpow2.f32 %v885_v12 }
 0x112   : > { %1410 = vpow2.f32 %v891_v14 }
 0x113   : > { %1412 = vpow2.f32 %v889_v15 }
 0x114   : > { %v1399_v48 = vpop.eup %1398 }
 0x115   : > { %v1401_v49 = vpop.eup %1400  ;;  %v618_v51 = vmul.f32 %v1399_v48, %v1146_v47  ;;  %v488_v48 = vld [vmem:[%s1728_s17 + $0x10] sm:$0xff] }
 0x116   : > { %v617_v52 = vmul.f32 %v1401_v49, %v1146_v47 }
 0x117   : > { %v629_v56 = vadd.f32 %v1147_v50, %v618_v51 }
 0x118   : > { %v1403_v53 = vpop.eup %1402  ;;  %v628_v54 = vadd.f32 %v1147_v50, %v617_v52 }
 0x119   : > { %v1405_v55 = vpop.eup %1404  ;;  %v620_v57 = vmul.f32 %v1403_v53, %v1146_v47 }
 0x11a   : > { %1273 = vmatprep.mubr.msk.f32.mxu1 %vm641_vm0, %v628_v54  ;;  %v619_v58 = vmul.f32 %v1405_v55, %v1146_v47  ;;  %v1407_v21 = vpop.eup %1406 }
 0x11b   : > { %1274 = vmatmul.mubr.msk.f32.gmra.mrb[4].mxu1 %vm641_vm0, %v629_v56  ;;  %v631_v60 = vadd.f32 %v1147_v50, %v620_v57  ;;  %v1409_v30 = vpop.eup %1408 }
 0x11c   : > { %v630_v59 = vadd.f32 %v1147_v50, %v619_v58  ;;  %v1411_v35 = vpop.eup %1410 }
 0x11d   : > { %v1413_v44 = vpop.eup %1412  ;;  %v896_v47 = vmul.f32 %v1411_v35, %v489_v38 }
 0x11e   : > { %1276 = vmatprep.mubr.msk.f32.mxu1 %vm641_vm0, %v630_v59 }
 0x11f   : > { %1277 = vmatmul.mubr.msk.f32.gmra.mrb[6].mxu1 %vm641_vm0, %v631_v60 }
 0x120   : > { %1283 = vmatprep.mubr.msk.f32.mxu1 %vm641_vm0, %v490_v33  ;;  %v894_v33 = vmul.f32 %v1407_v21, %v487_v24 }
 0x123   : > { %1284 = vmatmul.mubr.msk.f32.vlgmr.msra.gmra.mrb[8].mxu1 %vm641_vm0, %v491_v34  ;;  %v486_v34 = vld [vmem:[%s1728_s17] sm:$0xff]  ;;  %s1747_s17 = scalar_lea.hbm %s1803_s13, %s1176_s20 }
 0x124   : > { %1286 = vmatprep.mubr.msk.f32.mxu1 %vm641_vm0, %v492_v36  ;;  %1352 = vmatpush3.bf16.msra.mxu1 %v1349_v3  ;;  %v893_v43 = vmul.f32 %v1409_v30, %v486_v34 }
 0x125   : > { %1354 = vmatprep.subr.bf16.mxu1 %v1353_v6 }
 0x127   : > { %1287 = vmatmul.mubr.msk.f32.gmra.mrb[10].mxu1 %vm641_vm0, %v493_v37 }
 0x128   : > { %1289 = vmatprep.mubr.msk.f32.mxu1 %vm641_vm0, %v628_v54  ;;  %1356 = vmatpush3.bf16.msra.mxu1 %v1353_v6  ;;  %v895_v54 = vmul.f32 %v1413_v44, %v488_v48 }
 0x12b   : > { %1290 = vmatmul.mubr.msk.f32.gmra.mrb[12].mxu1 %vm641_vm0, %v629_v56 }
 0x12c   : > { %1292 = vmatprep.mubr.msk.f32.mxu1 %vm641_vm0, %v630_v59 }
 0x12f   : > { %1293 = vmatmul.mubr.msk.f32.gmra.mrb[14].mxu1 %vm641_vm0, %v631_v60 }
 0x1ee   : > { %v1275_v16 = vpop.f32.mrb[4].mxu1 }
 0x1ef   : > { %v758_v17 = vadd.f32 %v1275_v16, %v1148_v7  ;;  %v752_v18 = vpop.f32.mrb[5].mxu1 }
 0x1f0   : > { %v753_v19 = vadd.f32 %v1148_v7, %v752_v18 }
 0x1f1   : > { %v906_v20 = vsub.f32 0.0, %v758_v17 }
 0x1f2   : > { %v905_v22 = vsub.f32 0.0, %v753_v19  ;;  %v1278_v23 = vpop.f32.mrb[6].mxu1 }
 0x1f3   : > { %v768_v25 = vadd.f32 %v1278_v23, %v1148_v7  ;;  %v762_v26 = vpop.f32.mrb[7].mxu1  ;;  %v911_v27 = vmul.f32 1.442695, %v906_v20 }
 0x1f4   : > { %v763_v28 = vadd.f32 %v1148_v7, %v762_v26  ;;  %v909_v31 = vmul.f32 1.442695, %v905_v22 }
 0x1f5   : > { %v908_v32 = vsub.f32 0.0, %v768_v25  ;;  %1414 = vpow2.f32 %v911_v27 }
 0x1f6   : > { %v907_v36 = vsub.f32 0.0, %v763_v28  ;;  %v1285_v37 = vpop.f32.mrb[8].mxu1  ;;  %1416 = vpow2.f32 %v909_v31 }
 0x1f7   : > { %v852_v39 = vadd.f32 %v1285_v37, %v1157_v29  ;;  %v846_v40 = vpop.f32.mrb[9].mxu1  ;;  %v915_v41 = vmul.f32 1.442695, %v908_v32 }
 0x1f8   : > { %v847_v42 = vadd.f32 %v1157_v29, %v846_v40  ;;  %v913_v45 = vmul.f32 1.442695, %v907_v36 }
 0x1f9   : > { %v898_v46 = vadd.f32 %v894_v33, %v852_v39  ;;  %1418 = vpow2.f32 %v915_v41 }
 0x1fa   : > { %v897_v49 = vadd.f32 %v893_v43, %v847_v42  ;;  %v1288_v50 = vpop.f32.mrb[10].mxu1  ;;  %1420 = vpow2.f32 %v913_v45 }
 0x1fb   : > { %v862_v51 = vadd.f32 %v1288_v50, %v1157_v29  ;;  %v856_v52 = vpop.f32.mrb[11].mxu1 }
 0x1fc   : > { %v857_v53 = vadd.f32 %v1157_v29, %v856_v52 }
 0x1fd   : > { %v900_v55 = vadd.f32 %v896_v47, %v862_v51 }
 0x1fe   : > { %v899_v56 = vadd.f32 %v895_v54, %v857_v53  ;;  %v1291_v57 = vpop.f32.mrb[12].mxu1 }
 0x1ff   : > { %v872_v58 = vadd.f32 %v1291_v57, %v1157_v29  ;;  %v866_v59 = vpop.f32.mrb[13].mxu1  ;;  %v1415_v62 = vpop.eup %1414 }
 0x200   : > { %v867_v60 = vadd.f32 %v1157_v29, %v866_v59  ;;  %v1417_v1 = vpop.eup %1416 }
 0x201   : > { %v902_v61 = vsub.f32 %v898_v46, %v872_v58 }
 0x202   : > { %v901_v63 = vsub.f32 %v897_v49, %v867_v60  ;;  %v1294_v0 = vpop.f32.mrb[14].mxu1 }
 0x203   : > { %v918_v2 = vmul.f32 %v1415_v62, %v902_v61  ;;  %v882_v3 = vadd.f32 %v1294_v0, %v1157_v29  ;;  %v876_v4 = vpop.f32.mrb[15].mxu1  ;;  %v1419_v8 = vpop.eup %1418 }
 0x204   : > { %v917_v5 = vmul.f32 %v1417_v1, %v901_v63  ;;  %v877_v6 = vadd.f32 %v1157_v29, %v876_v4  ;;  %v1421_v10 = vpop.eup %1420 }
 0x205   : > { %v904_v7 = vsub.f32 %v900_v55, %v882_v3 }
 0x206   : > { %v903_v9 = vsub.f32 %v899_v56, %v877_v6  ;;  %1303 = vmatprep.mubr.msk.f32.mxu1 %vm932_vm1, %v917_v5 }
 0x207   : > { %v920_v11 = vmul.f32 %v1419_v8, %v904_v7  ;;  %1304 = vmatmul.mubr.msk.f32.vlgmr.msra.gmra.mrb[16].mxu1 %vm932_vm1, %v918_v2 }
 0x208   : > { %v919_v12 = vmul.f32 %v1421_v10, %v903_v9 }
 0x20a   : > { %1306 = vmatprep.mubr.msk.f32.mxu1 %vm932_vm1, %v919_v12 }
 0x20b   : > { %1307 = vmatmul.mubr.msk.f32.gmra.mrb[18].mxu1 %vm932_vm1, %v920_v11 }
 0x2da   : > { %v1305_v14 = vpop.f32.mrb[16].mxu1 }
 0x2db   : > { %v1017_v15 = vadd.f32 %v1305_v14, %v1166_v13  ;;  %v1011_v16 = vpop.f32.mrb[17].mxu1 }
 0x2dc   : > { %v1012_v17 = vadd.f32 %v1166_v13, %v1011_v16 }
 0x2dd   : > { %1031 = vst [vmem:[%s466_s2 + $0x8] sm:$0xff] %v1017_v15 }
 0x2de   : > { %1030 = vst [vmem:[%s466_s2] sm:$0xff] %v1012_v17  ;;  %v1308_v18 = vpop.f32.mrb[18].mxu1 }
 0x2df   : > { %v1027_v19 = vadd.f32 %v1308_v18, %v1166_v13  ;;  %v1021_v20 = vpop.f32.mrb[19].mxu1 }
 0x2e0   : > { %v1022_v21 = vadd.f32 %v1166_v13, %v1021_v20 }
 0x2e1   : > { %1033 = vst [vmem:[%s466_s2 + $0x18] sm:$0xff] %v1027_v19 }
 0x2e2   : > { %1032 = vst [vmem:[%s466_s2 + $0x10] sm:$0xff] %v1022_v21 }
 0x2e3   : > { %1435 = shalt.err (!%p1432_p3)
}
 0x2e4   : > { %s1436_s22 = scalar_lea.hbm %s1747_s17, 512  ;;  %s1440_s20 = scalar_lea.hbm %s1803_s13, 1024 }
 0x2e5   : > { %p1437_p4 = scmp.ne.s32.totalorder %s1747_s17, %s1436_s22  ;;  %p1441_p9 = scmp.lt.u32.totalorder %s1747_s17, %s1803_s13 }
 0x2e6   : > { %p1442_p10 = scmp.lt.u32.totalorder %s1440_s20, %s1436_s22  ;;  %p1444_p12 = scmp.lt.u32.totalorder %s1436_s22, %s1747_s17 }
 0x2e7   : > { %p1438_p7 = pnand %p1437_p4, %p1597_p5 }
 0x2e8   : > { %p1443_p11 = por %p1442_p10, %p1441_p9 }
 0x2e9   : > { %p1439_p8 = pneg %p1438_p7 }
 0x2ea   : > { %p1445_p13 = por %p1444_p12, %p1443_p11 }
 0x2ec   : > { %p1446_p0 = pnand %p1445_p13, %p1439_p8 }
 0x2ee   : > { %1449 = shalt.err (!%p1446_p0)
}
 0x2ef   : > { %s1487_s29 = smov 128   ;;  %s1488_s30 = smov 8  }
 0x2f0   : > { %1357 = dma.vmem_to_hbm [thread:$0]  (%p1597_p5), %s1742_s15, 512, %s1747_s17, %s1749_s24, %s1487_s29, %s1487_s29, %s1488_s30  }
 0x2f1 PF: > { %p1363_p1 = scmp.ge.s32.totalorder %s1484_s28, 2  ;;  %s1063_s14 = sand.u32 1, %s1472_s25  }
 0x2f2   : > { %s1064_s27 = scalar_lea.sflag [#allocation3], %s1063_s14 }
 0x2f3   : > { %p1360_p2 = pnand %p1363_p1, %p1601_p6 }
 0x2f5   : > { %1467 = dma.done.wait (!%p1360_p2), %s1064_s27, 512  }
 0x2f6   : > { %1469 = vsyncadd (!%p1360_p2), %s1064_s27, 4294966784  ;;  %s1814_s28 = sld [smem:[#allocation6_spill]]  ;;  %s1815_s22 = sld [smem:[#allocation5_spill]] }
 0x2f7   : > { %s1816_s27 = sld [smem:[#allocation7_spill]]  ;;  %s1817_s25 = smov %s1476_s26 }
 0x2fc   : > { %p23_p3 = scmp.ge.s32.totalorder %s1814_s28, 4   ;;  %s1818_s26 = smov %s1815_s22 }
 0x2fe   :  { %25 = sbr.rel (!%p23_p3) target bundleno = 5 (0x5), region = 113 }
 0x305   :  { %1069 = vsyncpa [#allocation3], 1 }
 0x306   :  { %1071 = vsyncpa [#allocation3 + $0x1], 1 }

</bundles_post_ra>
